<compile_context>
chip_gen: v7x
topology: tpu7x:2x2x1
jax: 0.10.0
libtpu: 0.0.40
codegen_flags: <defaults>
</compile_context>

<pallas_src>
import math

import jax
import jax.numpy as jnp
from jax.experimental import pallas as pl
from jax.experimental.pallas import tpu as pltpu

TILE_B = 512  # lane-axis batch tile; >=512 amortizes the ~0.35us/step grid overhead


def _dense_vpu(w_ref, b_ref, h):
    """y[j, :] = b[j] + sum_k w[j, k] * h[k, :]   (pure VPU broadcast-FMA)."""
    w = w_ref[...]                                   # [out, in]  (tiny)
    out_dim, in_dim = w.shape
    acc = jnp.broadcast_to(b_ref[...], (out_dim, h.shape[-1]))   # [out, TB]
    for k in range(in_dim):                          # static unroll, in_dim <= 10
        acc = acc + w[:, k:k + 1] * h[k:k + 1, :]    # [out,1] * [1,TB] -> [out,TB]
    return acc


def _sigmoid(z):
    # tanh-based sigmoid: one EUP transcendental, keeps VALU slots free and
    # matches jax.nn.sigmoid to a few ULPs (no approx-reciprocal error).
    return 0.5 * jnp.tanh(0.5 * z) + 0.5


def _mlp_kernel(x_ref, w1_ref, b1_ref, w2_ref, b2_ref, w3_ref, b3_ref, o_ref):
    x = x_ref[...]                                   # [input_size, TILE_B] f32
    h = _sigmoid(_dense_vpu(w1_ref, b1_ref, x))      # [10, TILE_B]
    h = _sigmoid(_dense_vpu(w2_ref, b2_ref, h))      # [10, TILE_B]
    z = _dense_vpu(w3_ref, b3_ref, h)                # [1,  TILE_B]
    o_ref[...] = z.astype(o_ref.dtype)


def linear_regression_forward(x, params, *, tile_b=TILE_B):
    """x: [B, input_size] f32; params in PyTorch layout (W:[out,in], b:[out,1]).

    Returns [B, 1], identical to the torch module's forward.
    """
    w1, b1, w2, b2, w3, b3 = params
    B, in_dim = x.shape
    n_tiles = pl.cdiv(B, tile_b)
    b_pad = n_tiles * tile_b
    # batch -> lane axis; pad ragged tail with zeros (sliced off afterwards)
    x_t = jnp.pad(x.T, ((0, 0), (0, b_pad - B)))     # [in_dim, B_pad]

    const = lambda shape: pl.BlockSpec(shape, lambda i: (0, 0))  # resident params

    out = pl.pallas_call(
        _mlp_kernel,
        out_shape=jax.ShapeDtypeStruct((1, b_pad), x.dtype),
        grid=(n_tiles,),
        in_specs=[
            pl.BlockSpec((in_dim, tile_b), lambda i: (0, i)),    # streamed x tile
            const(w1.shape), const(b1.shape),
            const(w2.shape), const(b2.shape),
            const(w3.shape), const(b3.shape),
        ],
        out_specs=pl.BlockSpec((1, tile_b), lambda i: (0, i)),   # lane-dense out
        compiler_params=pltpu.CompilerParams(
            dimension_semantics=("parallel",),
        ),
    )(x_t, w1, b1, w2, b2, w3, b3)
    return out[:, :B].T                               # [B, 1]


def init_params(key, input_size):
    """Deterministic xavier_uniform weights in torch [out, in] layout + zero biases."""
    def xavier(key, fan_out, fan_in):
        bound = math.sqrt(6.0 / (fan_in + fan_out))
        return jax.random.uniform(
            key, (fan_out, fan_in), jnp.float32, minval=-bound, maxval=bound
        )

    k1, k2, k3 = jax.random.split(key, 3)
    w1 = xavier(k1, 10, input_size); b1 = jnp.zeros((10, 1), jnp.float32)
    w2 = xavier(k2, 10, 10);         b2 = jnp.zeros((10, 1), jnp.float32)
    w3 = xavier(k3, 1, 10);          b3 = jnp.zeros((1, 1), jnp.float32)
    return (w1, b1, w2, b2, w3, b3)


def _reference(x, params):
    w1, b1, w2, b2, w3, b3 = params
    z = jax.nn.sigmoid(x @ w1.T + b1[:, 0])
    z = jax.nn.sigmoid(z @ w2.T + b2[:, 0])
    return z @ w3.T + b3[:, 0]


if __name__ == "__main__":
    key = jax.random.PRNGKey(0)
    kx, kp, kx2 = jax.random.split(key, 3)

    input_size = 4   # flow-feature vector for the cylinder regression
    batch = 8
    x = jax.random.normal(kx, (batch, input_size), jnp.float32)
    params = init_params(kp, input_size)

    out = jax.block_until_ready(linear_regression_forward(x, params))
    ref = _reference(x, params)
    assert out.shape == (batch, 1)
    assert jnp.allclose(out, ref, atol=1e-4), "mismatch vs reference (small batch)"

    # exercise the multi-tile grid + ragged-tail padding path
    big_batch = 1000   # 2 grid steps, last tile ragged
    xb = jax.random.normal(kx2, (big_batch, input_size), jnp.float32)
    out_b = jax.block_until_ready(linear_regression_forward(xb, params))
    ref_b = _reference(xb, params)
    assert out_b.shape == (big_batch, 1)
    assert jnp.allclose(out_b, ref_b, atol=1e-4), "mismatch vs reference (gridded batch)"

    print("KERNEL_OK")
</pallas_src>

<mosaic_0001>
module attributes {stable_mosaic.version = 11 : i64} {
  func.func @_mlp_kernel(%arg0: i32, %arg1: memref<4x512xf32, #tpu.memory_space<vmem>>, %arg2: memref<10x4xf32, #tpu.memory_space<vmem>>, %arg3: memref<10x1xf32, #tpu.memory_space<vmem>>, %arg4: memref<10x10xf32, #tpu.memory_space<vmem>>, %arg5: memref<10x1xf32, #tpu.memory_space<vmem>>, %arg6: memref<1x10xf32, #tpu.memory_space<vmem>>, %arg7: memref<1x1xf32, #tpu.memory_space<vmem>>, %arg8: memref<1x512xf32, #tpu.memory_space<vmem>>) attributes {dimension_semantics = [#tpu.dimension_semantics<parallel>], iteration_bounds = array<i64: 1>, scalar_prefetch = 0 : i64, scratch_operands = 0 : i64, tpu.core_type = #tpu.core_type<tc>, window_params = [{transform_indices = @transform_0, window_bounds = array<i64: 4, 512>}, {pipeline_mode = #tpu.pipeline_mode<synchronous>, transform_indices = @transform_1, window_bounds = array<i64: 10, 4>}, {pipeline_mode = #tpu.pipeline_mode<synchronous>, transform_indices = @transform_2, window_bounds = array<i64: 10, 1>}, {pipeline_mode = #tpu.pipeline_mode<synchronous>, transform_indices = @transform_3, window_bounds = array<i64: 10, 10>}, {pipeline_mode = #tpu.pipeline_mode<synchronous>, transform_indices = @transform_4, window_bounds = array<i64: 10, 1>}, {pipeline_mode = #tpu.pipeline_mode<synchronous>, transform_indices = @transform_5, window_bounds = array<i64: 1, 10>}, {pipeline_mode = #tpu.pipeline_mode<synchronous>, transform_indices = @transform_6, window_bounds = array<i64: 1, 1>}, {transform_indices = @transform_7, window_bounds = array<i64: 1, 512>}]} {
    %c0 = arith.constant 0 : index
    %c0_0 = arith.constant 0 : index
    %0 = vector.load %arg1[%c0, %c0_0] : memref<4x512xf32, #tpu.memory_space<vmem>>, vector<4x512xf32>
    %c0_1 = arith.constant 0 : index
    %c0_2 = arith.constant 0 : index
    %1 = vector.load %arg2[%c0_1, %c0_2] : memref<10x4xf32, #tpu.memory_space<vmem>>, vector<10x4xf32>
    %c0_3 = arith.constant 0 : index
    %c0_4 = arith.constant 0 : index
    %2 = vector.load %arg3[%c0_3, %c0_4] : memref<10x1xf32, #tpu.memory_space<vmem>>, vector<10x1xf32>
    %3 = vector.shape_cast %2 : vector<10x1xf32> to vector<10x1xf32>
    %4 = vector.broadcast %3 : vector<10x1xf32> to vector<10x512xf32>
    %5 = vector.extract_strided_slice %1 {offsets = [0, 0], sizes = [10, 1], strides = [1, 1]} : vector<10x4xf32> to vector<10x1xf32>
    %6 = vector.extract_strided_slice %0 {offsets = [0, 0], sizes = [1, 512], strides = [1, 1]} : vector<4x512xf32> to vector<1x512xf32>
    %7 = vector.broadcast %5 : vector<10x1xf32> to vector<10x512xf32>
    %8 = vector.broadcast %6 : vector<1x512xf32> to vector<10x512xf32>
    %9 = arith.mulf %7, %8 : vector<10x512xf32>
    %10 = arith.addf %4, %9 : vector<10x512xf32>
    %11 = vector.extract_strided_slice %1 {offsets = [0, 1], sizes = [10, 1], strides = [1, 1]} : vector<10x4xf32> to vector<10x1xf32>
    %12 = vector.extract_strided_slice %0 {offsets = [1, 0], sizes = [1, 512], strides = [1, 1]} : vector<4x512xf32> to vector<1x512xf32>
    %13 = vector.broadcast %11 : vector<10x1xf32> to vector<10x512xf32>
    %14 = vector.broadcast %12 : vector<1x512xf32> to vector<10x512xf32>
    %15 = arith.mulf %13, %14 : vector<10x512xf32>
    %16 = arith.addf %10, %15 : vector<10x512xf32>
    %17 = vector.extract_strided_slice %1 {offsets = [0, 2], sizes = [10, 1], strides = [1, 1]} : vector<10x4xf32> to vector<10x1xf32>
    %18 = vector.extract_strided_slice %0 {offsets = [2, 0], sizes = [1, 512], strides = [1, 1]} : vector<4x512xf32> to vector<1x512xf32>
    %19 = vector.broadcast %17 : vector<10x1xf32> to vector<10x512xf32>
    %20 = vector.broadcast %18 : vector<1x512xf32> to vector<10x512xf32>
    %21 = arith.mulf %19, %20 : vector<10x512xf32>
    %22 = arith.addf %16, %21 : vector<10x512xf32>
    %23 = vector.extract_strided_slice %1 {offsets = [0, 3], sizes = [10, 1], strides = [1, 1]} : vector<10x4xf32> to vector<10x1xf32>
    %24 = vector.extract_strided_slice %0 {offsets = [3, 0], sizes = [1, 512], strides = [1, 1]} : vector<4x512xf32> to vector<1x512xf32>
    %25 = vector.broadcast %23 : vector<10x1xf32> to vector<10x512xf32>
    %26 = vector.broadcast %24 : vector<1x512xf32> to vector<10x512xf32>
    %27 = arith.mulf %25, %26 : vector<10x512xf32>
    %28 = arith.addf %22, %27 : vector<10x512xf32>
    %cst = arith.constant 5.000000e-01 : f32
    %29 = vector.broadcast %cst : f32 to vector<10x512xf32>
    %30 = arith.mulf %29, %28 : vector<10x512xf32>
    %31 = math.tanh %30 : vector<10x512xf32>
    %cst_5 = arith.constant 5.000000e-01 : f32
    %32 = vector.broadcast %cst_5 : f32 to vector<10x512xf32>
    %33 = arith.mulf %32, %31 : vector<10x512xf32>
    %cst_6 = arith.constant 5.000000e-01 : f32
    %34 = vector.broadcast %cst_6 : f32 to vector<10x512xf32>
    %35 = arith.addf %33, %34 : vector<10x512xf32>
    %c0_7 = arith.constant 0 : index
    %c0_8 = arith.constant 0 : index
    %36 = vector.load %arg4[%c0_7, %c0_8] : memref<10x10xf32, #tpu.memory_space<vmem>>, vector<10x10xf32>
    %c0_9 = arith.constant 0 : index
    %c0_10 = arith.constant 0 : index
    %37 = vector.load %arg5[%c0_9, %c0_10] : memref<10x1xf32, #tpu.memory_space<vmem>>, vector<10x1xf32>
    %38 = vector.shape_cast %37 : vector<10x1xf32> to vector<10x1xf32>
    %39 = vector.broadcast %38 : vector<10x1xf32> to vector<10x512xf32>
    %40 = vector.extract_strided_slice %36 {offsets = [0, 0], sizes = [10, 1], strides = [1, 1]} : vector<10x10xf32> to vector<10x1xf32>
    %41 = vector.extract_strided_slice %35 {offsets = [0, 0], sizes = [1, 512], strides = [1, 1]} : vector<10x512xf32> to vector<1x512xf32>
    %42 = vector.broadcast %40 : vector<10x1xf32> to vector<10x512xf32>
    %43 = vector.broadcast %41 : vector<1x512xf32> to vector<10x512xf32>
    %44 = arith.mulf %42, %43 : vector<10x512xf32>
    %45 = arith.addf %39, %44 : vector<10x512xf32>
    %46 = vector.extract_strided_slice %36 {offsets = [0, 1], sizes = [10, 1], strides = [1, 1]} : vector<10x10xf32> to vector<10x1xf32>
    %47 = vector.extract_strided_slice %35 {offsets = [1, 0], sizes = [1, 512], strides = [1, 1]} : vector<10x512xf32> to vector<1x512xf32>
    %48 = vector.broadcast %46 : vector<10x1xf32> to vector<10x512xf32>
    %49 = vector.broadcast %47 : vector<1x512xf32> to vector<10x512xf32>
    %50 = arith.mulf %48, %49 : vector<10x512xf32>
    %51 = arith.addf %45, %50 : vector<10x512xf32>
    %52 = vector.extract_strided_slice %36 {offsets = [0, 2], sizes = [10, 1], strides = [1, 1]} : vector<10x10xf32> to vector<10x1xf32>
    %53 = vector.extract_strided_slice %35 {offsets = [2, 0], sizes = [1, 512], strides = [1, 1]} : vector<10x512xf32> to vector<1x512xf32>
    %54 = vector.broadcast %52 : vector<10x1xf32> to vector<10x512xf32>
    %55 = vector.broadcast %53 : vector<1x512xf32> to vector<10x512xf32>
    %56 = arith.mulf %54, %55 : vector<10x512xf32>
    %57 = arith.addf %51, %56 : vector<10x512xf32>
    %58 = vector.extract_strided_slice %36 {offsets = [0, 3], sizes = [10, 1], strides = [1, 1]} : vector<10x10xf32> to vector<10x1xf32>
    %59 = vector.extract_strided_slice %35 {offsets = [3, 0], sizes = [1, 512], strides = [1, 1]} : vector<10x512xf32> to vector<1x512xf32>
    %60 = vector.broadcast %58 : vector<10x1xf32> to vector<10x512xf32>
    %61 = vector.broadcast %59 : vector<1x512xf32> to vector<10x512xf32>
    %62 = arith.mulf %60, %61 : vector<10x512xf32>
    %63 = arith.addf %57, %62 : vector<10x512xf32>
    %64 = vector.extract_strided_slice %36 {offsets = [0, 4], sizes = [10, 1], strides = [1, 1]} : vector<10x10xf32> to vector<10x1xf32>
    %65 = vector.extract_strided_slice %35 {offsets = [4, 0], sizes = [1, 512], strides = [1, 1]} : vector<10x512xf32> to vector<1x512xf32>
    %66 = vector.broadcast %64 : vector<10x1xf32> to vector<10x512xf32>
    %67 = vector.broadcast %65 : vector<1x512xf32> to vector<10x512xf32>
    %68 = arith.mulf %66, %67 : vector<10x512xf32>
    %69 = arith.addf %63, %68 : vector<10x512xf32>
    %70 = vector.extract_strided_slice %36 {offsets = [0, 5], sizes = [10, 1], strides = [1, 1]} : vector<10x10xf32> to vector<10x1xf32>
    %71 = vector.extract_strided_slice %35 {offsets = [5, 0], sizes = [1, 512], strides = [1, 1]} : vector<10x512xf32> to vector<1x512xf32>
    %72 = vector.broadcast %70 : vector<10x1xf32> to vector<10x512xf32>
    %73 = vector.broadcast %71 : vector<1x512xf32> to vector<10x512xf32>
    %74 = arith.mulf %72, %73 : vector<10x512xf32>
    %75 = arith.addf %69, %74 : vector<10x512xf32>
    %76 = vector.extract_strided_slice %36 {offsets = [0, 6], sizes = [10, 1], strides = [1, 1]} : vector<10x10xf32> to vector<10x1xf32>
    %77 = vector.extract_strided_slice %35 {offsets = [6, 0], sizes = [1, 512], strides = [1, 1]} : vector<10x512xf32> to vector<1x512xf32>
    %78 = vector.broadcast %76 : vector<10x1xf32> to vector<10x512xf32>
    %79 = vector.broadcast %77 : vector<1x512xf32> to vector<10x512xf32>
    %80 = arith.mulf %78, %79 : vector<10x512xf32>
    %81 = arith.addf %75, %80 : vector<10x512xf32>
    %82 = vector.extract_strided_slice %36 {offsets = [0, 7], sizes = [10, 1], strides = [1, 1]} : vector<10x10xf32> to vector<10x1xf32>
    %83 = vector.extract_strided_slice %35 {offsets = [7, 0], sizes = [1, 512], strides = [1, 1]} : vector<10x512xf32> to vector<1x512xf32>
    %84 = vector.broadcast %82 : vector<10x1xf32> to vector<10x512xf32>
    %85 = vector.broadcast %83 : vector<1x512xf32> to vector<10x512xf32>
    %86 = arith.mulf %84, %85 : vector<10x512xf32>
    %87 = arith.addf %81, %86 : vector<10x512xf32>
    %88 = vector.extract_strided_slice %36 {offsets = [0, 8], sizes = [10, 1], strides = [1, 1]} : vector<10x10xf32> to vector<10x1xf32>
    %89 = vector.extract_strided_slice %35 {offsets = [8, 0], sizes = [1, 512], strides = [1, 1]} : vector<10x512xf32> to vector<1x512xf32>
    %90 = vector.broadcast %88 : vector<10x1xf32> to vector<10x512xf32>
    %91 = vector.broadcast %89 : vector<1x512xf32> to vector<10x512xf32>
    %92 = arith.mulf %90, %91 : vector<10x512xf32>
    %93 = arith.addf %87, %92 : vector<10x512xf32>
    %94 = vector.extract_strided_slice %36 {offsets = [0, 9], sizes = [10, 1], strides = [1, 1]} : vector<10x10xf32> to vector<10x1xf32>
    %95 = vector.extract_strided_slice %35 {offsets = [9, 0], sizes = [1, 512], strides = [1, 1]} : vector<10x512xf32> to vector<1x512xf32>
    %96 = vector.broadcast %94 : vector<10x1xf32> to vector<10x512xf32>
    %97 = vector.broadcast %95 : vector<1x512xf32> to vector<10x512xf32>
    %98 = arith.mulf %96, %97 : vector<10x512xf32>
    %99 = arith.addf %93, %98 : vector<10x512xf32>
    %cst_11 = arith.constant 5.000000e-01 : f32
    %100 = vector.broadcast %cst_11 : f32 to vector<10x512xf32>
    %101 = arith.mulf %100, %99 : vector<10x512xf32>
    %102 = math.tanh %101 : vector<10x512xf32>
    %cst_12 = arith.constant 5.000000e-01 : f32
    %103 = vector.broadcast %cst_12 : f32 to vector<10x512xf32>
    %104 = arith.mulf %103, %102 : vector<10x512xf32>
    %cst_13 = arith.constant 5.000000e-01 : f32
    %105 = vector.broadcast %cst_13 : f32 to vector<10x512xf32>
    %106 = arith.addf %104, %105 : vector<10x512xf32>
    %c0_14 = arith.constant 0 : index
    %c0_15 = arith.constant 0 : index
    %107 = vector.load %arg6[%c0_14, %c0_15] : memref<1x10xf32, #tpu.memory_space<vmem>>, vector<1x10xf32>
    %c0_16 = arith.constant 0 : index
    %c0_17 = arith.constant 0 : index
    %108 = vector.load %arg7[%c0_16, %c0_17] : memref<1x1xf32, #tpu.memory_space<vmem>>, vector<1x1xf32>
    %109 = vector.shape_cast %108 : vector<1x1xf32> to vector<1x1xf32>
    %110 = vector.broadcast %109 : vector<1x1xf32> to vector<1x512xf32>
    %111 = vector.extract_strided_slice %107 {offsets = [0, 0], sizes = [1, 1], strides = [1, 1]} : vector<1x10xf32> to vector<1x1xf32>
    %112 = vector.extract_strided_slice %106 {offsets = [0, 0], sizes = [1, 512], strides = [1, 1]} : vector<10x512xf32> to vector<1x512xf32>
    %113 = vector.broadcast %111 : vector<1x1xf32> to vector<1x512xf32>
    %114 = arith.mulf %113, %112 : vector<1x512xf32>
    %115 = arith.addf %110, %114 : vector<1x512xf32>
    %116 = vector.extract_strided_slice %107 {offsets = [0, 1], sizes = [1, 1], strides = [1, 1]} : vector<1x10xf32> to vector<1x1xf32>
    %117 = vector.extract_strided_slice %106 {offsets = [1, 0], sizes = [1, 512], strides = [1, 1]} : vector<10x512xf32> to vector<1x512xf32>
    %118 = vector.broadcast %116 : vector<1x1xf32> to vector<1x512xf32>
    %119 = arith.mulf %118, %117 : vector<1x512xf32>
    %120 = arith.addf %115, %119 : vector<1x512xf32>
    %121 = vector.extract_strided_slice %107 {offsets = [0, 2], sizes = [1, 1], strides = [1, 1]} : vector<1x10xf32> to vector<1x1xf32>
    %122 = vector.extract_strided_slice %106 {offsets = [2, 0], sizes = [1, 512], strides = [1, 1]} : vector<10x512xf32> to vector<1x512xf32>
    %123 = vector.broadcast %121 : vector<1x1xf32> to vector<1x512xf32>
    %124 = arith.mulf %123, %122 : vector<1x512xf32>
    %125 = arith.addf %120, %124 : vector<1x512xf32>
    %126 = vector.extract_strided_slice %107 {offsets = [0, 3], sizes = [1, 1], strides = [1, 1]} : vector<1x10xf32> to vector<1x1xf32>
    %127 = vector.extract_strided_slice %106 {offsets = [3, 0], sizes = [1, 512], strides = [1, 1]} : vector<10x512xf32> to vector<1x512xf32>
    %128 = vector.broadcast %126 : vector<1x1xf32> to vector<1x512xf32>
    %129 = arith.mulf %128, %127 : vector<1x512xf32>
    %130 = arith.addf %125, %129 : vector<1x512xf32>
    %131 = vector.extract_strided_slice %107 {offsets = [0, 4], sizes = [1, 1], strides = [1, 1]} : vector<1x10xf32> to vector<1x1xf32>
    %132 = vector.extract_strided_slice %106 {offsets = [4, 0], sizes = [1, 512], strides = [1, 1]} : vector<10x512xf32> to vector<1x512xf32>
    %133 = vector.broadcast %131 : vector<1x1xf32> to vector<1x512xf32>
    %134 = arith.mulf %133, %132 : vector<1x512xf32>
    %135 = arith.addf %130, %134 : vector<1x512xf32>
    %136 = vector.extract_strided_slice %107 {offsets = [0, 5], sizes = [1, 1], strides = [1, 1]} : vector<1x10xf32> to vector<1x1xf32>
    %137 = vector.extract_strided_slice %106 {offsets = [5, 0], sizes = [1, 512], strides = [1, 1]} : vector<10x512xf32> to vector<1x512xf32>
    %138 = vector.broadcast %136 : vector<1x1xf32> to vector<1x512xf32>
    %139 = arith.mulf %138, %137 : vector<1x512xf32>
    %140 = arith.addf %135, %139 : vector<1x512xf32>
    %141 = vector.extract_strided_slice %107 {offsets = [0, 6], sizes = [1, 1], strides = [1, 1]} : vector<1x10xf32> to vector<1x1xf32>
    %142 = vector.extract_strided_slice %106 {offsets = [6, 0], sizes = [1, 512], strides = [1, 1]} : vector<10x512xf32> to vector<1x512xf32>
    %143 = vector.broadcast %141 : vector<1x1xf32> to vector<1x512xf32>
    %144 = arith.mulf %143, %142 : vector<1x512xf32>
    %145 = arith.addf %140, %144 : vector<1x512xf32>
    %146 = vector.extract_strided_slice %107 {offsets = [0, 7], sizes = [1, 1], strides = [1, 1]} : vector<1x10xf32> to vector<1x1xf32>
    %147 = vector.extract_strided_slice %106 {offsets = [7, 0], sizes = [1, 512], strides = [1, 1]} : vector<10x512xf32> to vector<1x512xf32>
    %148 = vector.broadcast %146 : vector<1x1xf32> to vector<1x512xf32>
    %149 = arith.mulf %148, %147 : vector<1x512xf32>
    %150 = arith.addf %145, %149 : vector<1x512xf32>
    %151 = vector.extract_strided_slice %107 {offsets = [0, 8], sizes = [1, 1], strides = [1, 1]} : vector<1x10xf32> to vector<1x1xf32>
    %152 = vector.extract_strided_slice %106 {offsets = [8, 0], sizes = [1, 512], strides = [1, 1]} : vector<10x512xf32> to vector<1x512xf32>
    %153 = vector.broadcast %151 : vector<1x1xf32> to vector<1x512xf32>
    %154 = arith.mulf %153, %152 : vector<1x512xf32>
    %155 = arith.addf %150, %154 : vector<1x512xf32>
    %156 = vector.extract_strided_slice %107 {offsets = [0, 9], sizes = [1, 1], strides = [1, 1]} : vector<1x10xf32> to vector<1x1xf32>
    %157 = vector.extract_strided_slice %106 {offsets = [9, 0], sizes = [1, 512], strides = [1, 1]} : vector<10x512xf32> to vector<1x512xf32>
    %158 = vector.broadcast %156 : vector<1x1xf32> to vector<1x512xf32>
    %159 = arith.mulf %158, %157 : vector<1x512xf32>
    %160 = arith.addf %155, %159 : vector<1x512xf32>
    %c0_18 = arith.constant 0 : index
    %c0_19 = arith.constant 0 : index
    %161 = vector.load %arg8[%c0_18, %c0_19] : memref<1x512xf32, #tpu.memory_space<vmem>>, vector<1x512xf32>
    tpu.vector_store %arg8[%c0_18, %c0_19], %160 {strides = array<i32>} : memref<1x512xf32, #tpu.memory_space<vmem>>, vector<1x512xf32>,
    return
  }
  func.func @transform_0(%arg0: i32) -> (i32, i32) {
    %c0_i32 = arith.constant 0 : i32
    %c0_i32_0 = arith.constant 0 : i32
    return %c0_i32, %arg0 : i32, i32
  }
  func.func @transform_1(%arg0: i32) -> (i32, i32) {
    %c0_i32 = arith.constant 0 : i32
    %c0_i32_0 = arith.constant 0 : i32
    %c0_i32_1 = arith.constant 0 : i32
    return %c0_i32, %c0_i32_0 : i32, i32
  }
  func.func @transform_2(%arg0: i32) -> (i32, i32) {
    %c0_i32 = arith.constant 0 : i32
    %c0_i32_0 = arith.constant 0 : i32
    %c0_i32_1 = arith.constant 0 : i32
    return %c0_i32, %c0_i32_0 : i32, i32
  }
  func.func @transform_3(%arg0: i32) -> (i32, i32) {
    %c0_i32 = arith.constant 0 : i32
    %c0_i32_0 = arith.constant 0 : i32
    %c0_i32_1 = arith.constant 0 : i32
    return %c0_i32, %c0_i32_0 : i32, i32
  }
  func.func @transform_4(%arg0: i32) -> (i32, i32) {
    %c0_i32 = arith.constant 0 : i32
    %c0_i32_0 = arith.constant 0 : i32
    %c0_i32_1 = arith.constant 0 : i32
    return %c0_i32, %c0_i32_0 : i32, i32
  }
  func.func @transform_5(%arg0: i32) -> (i32, i32) {
    %c0_i32 = arith.constant 0 : i32
    %c0_i32_0 = arith.constant 0 : i32
    %c0_i32_1 = arith.constant 0 : i32
    return %c0_i32, %c0_i32_0 : i32, i32
  }
  func.func @transform_6(%arg0: i32) -> (i32, i32) {
    %c0_i32 = arith.constant 0 : i32
    %c0_i32_0 = arith.constant 0 : i32
    %c0_i32_1 = arith.constant 0 : i32
    return %c0_i32, %c0_i32_0 : i32, i32
  }
  func.func @transform_7(%arg0: i32) -> (i32, i32) {
    %c0_i32 = arith.constant 0 : i32
    %c0_i32_0 = arith.constant 0 : i32
    return %c0_i32, %arg0 : i32, i32
  }
}

</mosaic_0001>

<bundles_post_ra>
// kernel: tpu_custom_call.1
= control target key start
LH: loop header
LB: loop body
LE: loop exit
PB: predicated region body
PF: predicated region fallthrough
CT: control target
= control target key end

     0   :  { %s1831_s0 = inlined_call_operand.vmem [shape: f32[4,512], index: 0, kind: input, shape index: {}]   ;;  %s1832_s1 = inlined_call_operand.vmem [shape: f32[10,4], index: 1, kind: input, shape index: {}]   ;;  %s1833_s2 = inlined_call_operand.vmem [shape: f32[10,1], index: 2, kind: input, shape index: {}]   ;;  %s1834_s3 = inlined_call_operand.vmem [shape: f32[10,10], index: 3, kind: input, shape index: {}]   ;;  %s1835_s4 = inlined_call_operand.vmem [shape: f32[10,1], index: 4, kind: input, shape index: {}]   ;;  %s1836_s5 = inlined_call_operand.vmem [shape: f32[1,10], index: 5, kind: input, shape index: {}]   ;;  %s1837_s6 = inlined_call_operand.<no memory space> [shape: f32[1,1], index: 6, kind: input, shape index: {}]   ;;  %s1838_s7 = inlined_call_operand.hbm [shape: f32[1,512], index: 7, kind: output, shape index: {}]  }
   0x1   :  { %v12_v0 = vstv %s1837_s6 }
   0x2   :  { %13 = vst [vmem:[#allocation2] sm:$0x1] %v12_v0 }
   0x3   :  { %v33_v1 = vld [vmem:[%s1833_s2] sm:$0xff]  ;;  %v1194_v3 = vmov 0   ;;  %v32_v4 = vld [vmem:[%s1832_s1 + $0x8] sm:$0x3] }
   0x4   :  { %v31_v2 = vld [vmem:[%s1832_s1] sm:$0xff]  ;;  %1098 = vset.pattern.permute.xlu1 %v1194_v3  ;;  %1097 = vset.pattern.permute.xlu0 %v1194_v3 }
   0x5   :  { %37 = vperm.xlu0 %1097, %v33_v1   ;;  %47 = vperm.xlu1 %1098, %v31_v2  }
   0x6   :  { %14 = vsyncpa [#allocation4], 0  ;;  %v1195_v5 = vmov 1   ;;  %v1196_v6 = vmov 2   ;;  %v1197_v7 = vmov 3   ;;  %v321_v8 = vld [vmem:[%s1834_s3] sm:$0xff]  ;;  %v1839_v21 = vlaneseq }
   0x7   :  { %v1198_v9 = vmov 5   ;;  %v34_v10 = vld [vmem:[%s1833_s2 + $0x8] sm:$0x3]  ;;  %v323_v11 = vld [vmem:[%s1835_s4] sm:$0xff]  ;;  %v1199_v13 = vmov 4   ;;  %v1200_v14 = vmov 6  }
   0x8   :  { %v322_v12 = vld [vmem:[%s1834_s3 + $0x8] sm:$0x3]  ;;  %v1201_v15 = vmov 9   ;;  %v1202_v16 = vmov 7   ;;  %v1203_v18 = vmov 8   ;;  %v1314_v22 = vshrl.u32 %v1839_v21, 7 }
   0x9   :  { %1102 = vset.pattern.permute.xlu0 %v1195_v5  ;;  %1099 = vset.pattern.permute.xlu1 %v1195_v5  ;;  %v770_v17 = vld [vmem:[#allocation2] sm:$0x1]  ;;  %v324_v20 = vld [vmem:[%s1835_s4 + $0x8] sm:$0x3] }
   0xa   :  { %114 = vperm.xlu0 %1102, %v32_v4   ;;  %110 = vperm.xlu1 %1099, %v31_v2   ;;  %v1292_v19 = vld [vmem:[%s1836_s5] sm:$0x1]  ;;  %1847 = vst [vmem:[#allocation6_spill] sm:$0xff] %v1314_v22  ;;  %v1318_v23 = vsub.s32 0, %v1314_v22  ;;  %v1321_v24 = vsub.s32 4, %v1314_v22  ;;  %v30_v26 = vld [vmem:[%s1831_s0 + $0x8] sm:$0xff] }
   0xb   :  { %v29_v25 = vld [vmem:[%s1831_s0] sm:$0xff]  ;;  %v1331_v27 = vsub.s32 1, %v1314_v22  ;;  %v1334_v28 = vsub.s32 5, %v1314_v22  ;;  %v1341_v33 = vsub.s32 2, %v1314_v22  ;;  %v1344_v34 = vsub.s32 6, %v1314_v22  ;;  %s1205_s0 = smov [#allocation3]  }
   0xc   :  { %1848 = vst [vmem:[#allocation7_spill] sm:$0xff] %v1318_v23  ;;  %v60_v29 = vrot.slane %v29_v25, %v1318_v23  ;;  %v68_v30 = vrot.slane %v30_v26, %v1318_v23  ;;  %v64_v31 = vrot.slane %v29_v25, %v1321_v24  ;;  %v72_v32 = vrot.slane %v30_v26, %v1321_v24  ;;  %s1077_s19 = sshll.u32 %s1205_s0, 4  ;;  %s1078_s19 = int_to_ptr.vmem [resolvable:$true] %s1077_s19 }
   0xd   :  { %v120_v35 = vrot.slane %v29_v25, %v1331_v27  ;;  %v124_v36 = vrot.slane %v29_v25, %v1334_v28  ;;  %v128_v37 = vrot.slane %v30_v26, %v1331_v27  ;;  %v132_v38 = vrot.slane %v30_v26, %v1334_v28  ;;  %s1170_s20 = scalar_lea.vmem %s1078_s19, 64  ;;  %p1175_p1 = scmp.lt.s32.totalorder %s1078_s19, %s1078_s19 }
   0xe   :  { %1103 = vset.pattern.permute.xlu0 %v1196_v6  ;;  %1100 = vset.pattern.permute.xlu1 %v1197_v7  ;;  %v1352_v39 = vsub.s32 3, %v1314_v22  ;;  %v1355_v40 = vsub.s32 7, %v1314_v22  ;;  %v1358_v42 = vrot.slane %v60_v29, %v1318_v23  ;;  %v1361_v43 = vrot.slane %v68_v30, %v1318_v23  ;;  %p1171_p0 = scmp.ne.s32.totalorder %s1078_s19, %s1170_s20  ;;  %p1176_p2 = scmp.lt.s32.totalorder %s1170_s20, %s1170_s20 }
   0xf   :  { %170 = vperm.xlu0 %1103, %v31_v2   ;;  %230 = vperm.xlu1 %1100, %v31_v2   ;;  %v1364_v45 = vrot.slane %v64_v31, %v1318_v23  ;;  %v1367_v46 = vrot.slane %v72_v32, %v1318_v23  ;;  %v180_v47 = vrot.slane %v29_v25, %v1341_v33 }
  0x10   :  { %v184_v48 = vrot.slane %v29_v25, %v1344_v34  ;;  %v188_v49 = vrot.slane %v30_v26, %v1341_v33  ;;  %v192_v50 = vrot.slane %v30_v26, %v1344_v34  ;;  %v1375_v51 = vrot.slane %v120_v35, %v1331_v27  ;;  %p1177_p3 = por %p1176_p2, %p1175_p1 }
  0x11   :  { %v1378_v52 = vrot.slane %v124_v36, %v1331_v27  ;;  %v1381_v53 = vrot.slane %v128_v37, %v1331_v27  ;;  %v1384_v54 = vrot.slane %v132_v38, %v1331_v27  ;;  %v240_v55 = vrot.slane %v29_v25, %v1352_v39 }
  0x12   :  { %v244_v56 = vrot.slane %v29_v25, %v1355_v40  ;;  %v248_v57 = vrot.slane %v30_v26, %v1352_v39  ;;  %v252_v58 = vrot.slane %v30_v26, %v1355_v40  ;;  %v1396_v1 = vrot.slane %v180_v47, %v1341_v33  ;;  %p1178_p4 = pnand %p1177_p3, %p1171_p0 }
  0x13   :  { %418 = vperm.xlu0 %1103, %v321_v8   ;;  %1101 = vset.pattern.permute.xlu1 %v1194_v3  ;;  %v1399_v2 = vrot.slane %v184_v48, %v1341_v33 }
  0x14   :  { %52 = vperm.xlu1 %1101, %v32_v4  }
  0x17   :  { %1110 = vset.pattern.permute.xlu0 %v1198_v9 }
  0x18   :  { %538 = vperm.xlu0 %1110, %v321_v8   ;;  %1104 = vset.pattern.permute.xlu1 %v1196_v6 }
  0x19   :  { %174 = vperm.xlu1 %1104, %v32_v4  }
  0x1c   :  { %1111 = vset.pattern.permute.xlu0 %v1194_v3 }
  0x1d   :  { %42 = vperm.xlu0 %1111, %v34_v10   ;;  %1105 = vset.pattern.permute.xlu1 %v1197_v7  ;;  %v1416_v10 = vrot.slane %v244_v56, %v1352_v39 }
  0x1e   :  { %234 = vperm.xlu1 %1105, %v32_v4   ;;  %v1405_v4 = vrot.slane %v192_v50, %v1341_v33 }
  0x21   :  { %337 = vperm.xlu0 %1111, %v321_v8  }
  0x22   :  { %1106 = vset.pattern.permute.xlu1 %v1194_v3 }
  0x23   :  { %327 = vperm.xlu1 %1106, %v323_v11   ;;  %v1419_v11 = vrot.slane %v248_v57, %v1352_v39 }
  0x25   :  { %342 = vperm.xlu0 %1111, %v322_v12  }
  0x27   :  { %1107 = vset.pattern.permute.xlu1 %v1195_v5 }
  0x28   :  { %378 = vperm.xlu1 %1107, %v321_v8  }
  0x29   :  { %1116 = vset.pattern.permute.xlu0 %v1195_v5 }
  0x2a   :  { %382 = vperm.xlu0 %1116, %v322_v12  }
  0x2c   :  { %1108 = vset.pattern.permute.xlu1 %v1197_v7 }
  0x2d   :  { %458 = vperm.xlu1 %1108, %v321_v8  }
  0x2e   :  { %1119 = vset.pattern.permute.xlu0 %v1197_v7 }
  0x2f   :  { %462 = vperm.xlu0 %1119, %v322_v12  }
  0x31   :  { %1109 = vset.pattern.permute.xlu1 %v1199_v13 }
  0x32   :  { %498 = vperm.xlu1 %1109, %v321_v8  }
  0x33   :  { %1122 = vset.pattern.permute.xlu0 %v1200_v14 }
  0x34   :  { %582 = vperm.xlu0 %1122, %v322_v12  }
  0x36   :  { %1112 = vset.pattern.permute.xlu1 %v1200_v14 }
  0x37   :  { %578 = vperm.xlu1 %1112, %v321_v8  }
  0x38   :  { %1125 = vset.pattern.permute.xlu0 %v1201_v15 }
  0x39   :  { %702 = vperm.xlu0 %1125, %v322_v12  }
  0x3b   :  { %1113 = vset.pattern.permute.xlu1 %v1202_v16 }
  0x3c   :  { %618 = vperm.xlu1 %1113, %v321_v8  }
  0x3d   :  { %1128 = vset.pattern.permute.xlu0 %v1194_v3 }
  0x3e   :  { %773 = vperm.xlu0 %1128, %v770_v17  }
  0x40   :  { %1114 = vset.pattern.permute.xlu1 %v1203_v18 }
  0x41   :  { %658 = vperm.xlu1 %1114, %v321_v8  }
  0x42   :  { %1131 = vset.pattern.permute.xlu0 %v1199_v13 }
  0x43   :  { %882 = vperm.xlu0 %1131, %v1292_v19  }
  0x45   :  { %1115 = vset.pattern.permute.xlu1 %v1194_v3 }
  0x46   :  { %332 = vperm.xlu1 %1115, %v324_v20  }
  0x47   :  { %1134 = vset.pattern.permute.xlu0 %v1202_v16 }
  0x48   :  { %966 = vperm.xlu0 %1134, %v1292_v19  }
  0x4a   :  { %1117 = vset.pattern.permute.xlu1 %v1201_v15 }
  0x4b   :  { %698 = vperm.xlu1 %1117, %v321_v8  }
  0x4c   :  { %1137 = vset.pattern.permute.xlu0 %v1201_v15 }
  0x4f   :  { %1118 = vset.pattern.permute.xlu1 %v1196_v6 }
  0x50   :  { %422 = vperm.xlu1 %1118, %v322_v12  }
  0x54   :  { %1120 = vset.pattern.permute.xlu1 %v1199_v13 }
  0x55   :  { %502 = vperm.xlu1 %1120, %v322_v12  }
  0x59   :  { %1121 = vset.pattern.permute.xlu1 %v1198_v9 }
  0x5a   :  { %542 = vperm.xlu1 %1121, %v322_v12  }
  0x5e   :  { %1123 = vset.pattern.permute.xlu1 %v1202_v16 }
  0x5f   :  { %622 = vperm.xlu1 %1123, %v322_v12  }
  0x63   :  { %1124 = vset.pattern.permute.xlu1 %v1203_v18 }
  0x64   :  { %662 = vperm.xlu1 %1124, %v322_v12   ;;  %v1422_v12 = vrot.slane %v252_v58, %v1352_v39 }
  0x68   :  { %1126 = vset.pattern.permute.xlu1 %v1194_v3  ;;  %v1402_v3 = vrot.slane %v188_v49, %v1341_v33 }
  0x69   :  { %782 = vperm.xlu1 %1126, %v1292_v19  }
  0x6d   :  { %1127 = vset.pattern.permute.xlu1 %v1195_v5 }
  0x6e   :  { %798 = vperm.xlu1 %1127, %v1292_v19  }
  0x72   :  { %1129 = vset.pattern.permute.xlu1 %v1196_v6 }
  0x73   :  { %826 = vperm.xlu1 %1129, %v1292_v19  }
  0x77   :  { %1130 = vset.pattern.permute.xlu1 %v1197_v7 }
  0x78   :  { %854 = vperm.xlu1 %1130, %v1292_v19  }
  0x7c   :  { %1132 = vset.pattern.permute.xlu1 %v1198_v9  ;;  %v1413_v9 = vrot.slane %v240_v55, %v1352_v39 }
  0x7d   :  { %910 = vperm.xlu1 %1132, %v1292_v19  }
  0x81   :  { %1133 = vset.pattern.permute.xlu1 %v1200_v14 }
  0x82   :  { %938 = vperm.xlu1 %1133, %v1292_v19  }
  0x84   :  { %v48_v41 = vpop.permute.xlu1 %47  ;;  %v38_v44 = vpop.permute.xlu0 %37 }
  0x85   :  { %v93_v59 = vmul.f32 %v1358_v42, %v48_v41  ;;  %v95_v60 = vmul.f32 %v1361_v43, %v48_v41  ;;  %v94_v61 = vmul.f32 %v1364_v45, %v48_v41  ;;  %v96_v62 = vmul.f32 %v1367_v46, %v48_v41 }
  0x86   :  { %1135 = vset.pattern.permute.xlu1 %v1203_v18 }
  0x87   :  { %994 = vperm.xlu1 %1135, %v1292_v19   ;;  %v101_v13 = vadd.f32 %v93_v59, %v38_v44  ;;  %v103_v14 = vadd.f32 %v95_v60, %v38_v44  ;;  %v102_v16 = vadd.f32 %v94_v61, %v38_v44  ;;  %v104_v17 = vadd.f32 %v96_v62, %v38_v44 }
  0x89   :  { %v111_v63 = vpop.permute.xlu1 %110  ;;  %v115_v0 = vpop.permute.xlu0 %114 }
  0x8a   :  { %v153_v5 = vmul.f32 %v1375_v51, %v111_v63  ;;  %v154_v6 = vmul.f32 %v1378_v52, %v111_v63  ;;  %v155_v7 = vmul.f32 %v1381_v53, %v111_v63  ;;  %v156_v8 = vmul.f32 %v1384_v54, %v111_v63 }
  0x8b   :  { %1136 = vset.pattern.permute.xlu1 %v1201_v15 }
  0x8c   :  { %1010 = vperm.xlu1 %1136, %v1292_v19   ;;  %v161_v20 = vadd.f32 %v153_v5, %v101_v13  ;;  %v162_v25 = vadd.f32 %v154_v6, %v102_v16  ;;  %v163_v26 = vadd.f32 %v155_v7, %v103_v14  ;;  %v164_v29 = vadd.f32 %v156_v8, %v104_v17 }
  0x8d   :  { %v157_v6 = vmul.f32 %v1375_v51, %v115_v0  ;;  %v158_v7 = vmul.f32 %v1378_v52, %v115_v0  ;;  %v159_v8 = vmul.f32 %v1381_v53, %v115_v0 }
  0x8e   :  { %v171_v18 = vpop.permute.xlu0 %170  ;;  %v231_v15 = vpop.permute.xlu1 %230 }
  0x8f   :  { %v213_v30 = vmul.f32 %v1396_v1, %v171_v18  ;;  %v214_v31 = vmul.f32 %v1399_v2, %v171_v18  ;;  %v215_v32 = vmul.f32 %v1402_v3, %v171_v18  ;;  %v216_v35 = vmul.f32 %v1405_v4, %v171_v18 }
  0x90   :  { %v273_v36 = vmul.f32 %v1413_v9, %v231_v15  ;;  %v274_v19 = vmul.f32 %v1416_v10, %v231_v15  ;;  %v275_v37 = vmul.f32 %v1419_v11, %v231_v15  ;;  %v276_v38 = vmul.f32 %v1422_v12, %v231_v15 }
  0x91   :  { %v221_v41 = vadd.f32 %v213_v30, %v161_v20  ;;  %v222_v44 = vadd.f32 %v214_v31, %v162_v25  ;;  %v223_v47 = vadd.f32 %v215_v32, %v163_v26  ;;  %v224_v48 = vadd.f32 %v216_v35, %v164_v29 }
  0x92   :  { %v1433_v49 = vpop.permute.xlu0 %418  ;;  %v160_v15 = vmul.f32 %v1384_v54, %v115_v0 }
  0x93   :  { %v53_v50 = vpop.permute.xlu1 %52  ;;  %v281_v55 = vadd.f32 %v273_v36, %v221_v41  ;;  %v282_v56 = vadd.f32 %v274_v19, %v222_v44  ;;  %v283_v57 = vadd.f32 %v275_v37, %v223_v47  ;;  %v284_v58 = vadd.f32 %v276_v38, %v224_v48 }
  0x94   :  { %v97_v13 = vmul.f32 %v1358_v42, %v53_v50  ;;  %v99_v14 = vmul.f32 %v1361_v43, %v53_v50  ;;  %v98_v16 = vmul.f32 %v1364_v45, %v53_v50  ;;  %v100_v17 = vmul.f32 %v1367_v46, %v53_v50 }
  0x95   :  { %v289_v59 = vmul.f32 0.5, %v281_v55  ;;  %v290_v60 = vmul.f32 0.5, %v282_v56  ;;  %v291_v61 = vmul.f32 0.5, %v283_v57  ;;  %v292_v62 = vmul.f32 0.5, %v284_v58 }
  0x97   :  { %v1435_v63 = vpop.permute.xlu0 %538  ;;  %1138 = vtanh.f32 %v289_v59 }
  0x98   :  { %v175_v5 = vpop.permute.xlu1 %174  ;;  %1140 = vtanh.f32 %v290_v60 }
  0x99   :  { %1142 = vtanh.f32 %v291_v61  ;;  %v217_v53 = vmul.f32 %v1396_v1, %v175_v5  ;;  %v218_v42 = vmul.f32 %v1399_v2, %v175_v5  ;;  %v219_v45 = vmul.f32 %v1402_v3, %v175_v5 }
  0x9a   :  { %1144 = vtanh.f32 %v292_v62  ;;  %v220_v41 = vmul.f32 %v1405_v4, %v175_v5 }
  0x9c   :  { %v43_v18 = vpop.permute.xlu0 %42 }
  0x9d   :  { %v105_v20 = vadd.f32 %v97_v13, %v43_v18  ;;  %v107_v25 = vadd.f32 %v99_v14, %v43_v18  ;;  %v235_v26 = vpop.permute.xlu1 %234  ;;  %v106_v29 = vadd.f32 %v98_v16, %v43_v18  ;;  %v108_v51 = vadd.f32 %v100_v17, %v43_v18 }
  0x9e   :  { %v277_v35 = vmul.f32 %v1413_v9, %v235_v26  ;;  %v278_v2 = vmul.f32 %v1416_v10, %v235_v26  ;;  %v279_v50 = vmul.f32 %v1419_v11, %v235_v26  ;;  %v280_v4 = vmul.f32 %v1422_v12, %v235_v26 }
  0x9f   :  { %v165_v30 = vadd.f32 %v157_v6, %v105_v20  ;;  %v166_v52 = vadd.f32 %v158_v7, %v106_v29  ;;  %v167_v31 = vadd.f32 %v159_v8, %v107_v25  ;;  %v168_v32 = vadd.f32 %v160_v15, %v108_v51 }
  0xa0   :  { %v338_v12 = vpop.permute.xlu0 %337 }
  0xa1   :  { %v1139_v43 = vpop.eup %1138  ;;  %v225_v46 = vadd.f32 %v217_v53, %v165_v30  ;;  %v226_v19 = vadd.f32 %v218_v42, %v166_v52  ;;  %v227_v44 = vadd.f32 %v219_v45, %v167_v31  ;;  %v228_v56 = vadd.f32 %v220_v41, %v168_v32 }
  0xa2   :  { %v1141_v54 = vpop.eup %1140  ;;  %v328_v0 = vpop.permute.xlu1 %327  ;;  %v305_v36 = vmul.f32 0.5, %v1139_v43 }
  0xa3   :  { %v1143_v37 = vpop.eup %1142  ;;  %v306_v38 = vmul.f32 0.5, %v1141_v54  ;;  %v285_v47 = vadd.f32 %v277_v35, %v225_v46  ;;  %v286_v58 = vadd.f32 %v278_v2, %v226_v19  ;;  %v287_v61 = vadd.f32 %v279_v50, %v227_v44 }
  0xa4   :  { %v1145_v1 = vpop.eup %1144  ;;  %v307_v48 = vmul.f32 0.5, %v1143_v37  ;;  %v1452_v55 = vadd.f32 0.5, %v305_v36  ;;  %v288_v5 = vadd.f32 %v280_v4, %v228_v56  ;;  %v343_v32 = vpop.permute.xlu0 %342 }
  0xa5   :  { %v308_v3 = vmul.f32 0.5, %v1145_v1  ;;  %v1454_v9 = vadd.f32 0.5, %v306_v38  ;;  %v293_v62 = vmul.f32 0.5, %v285_v47  ;;  %v294_v6 = vmul.f32 0.5, %v286_v58 }
  0xa6   :  { %v1456_v57 = vadd.f32 0.5, %v307_v48  ;;  %v348_v10 = vrot.slane %v1452_v55, %v1318_v23  ;;  %v295_v13 = vmul.f32 0.5, %v287_v61  ;;  %v296_v16 = vmul.f32 0.5, %v288_v5 }
  0xa7   :  { %v379_v59 = vpop.permute.xlu1 %378  ;;  %v1458_v60 = vadd.f32 0.5, %v308_v3  ;;  %v352_v11 = vrot.slane %v1454_v9, %v1318_v23  ;;  %1146 = vtanh.f32 %v293_v62  ;;  %v388_v25 = vrot.slane %v1452_v55, %v1331_v27 }
  0xa8   :  { %v1467_v7 = vrot.slane %v1456_v57, %v1318_v23  ;;  %v361_v17 = vmul.f32 %v348_v10, %v338_v12  ;;  %1148 = vtanh.f32 %v294_v6  ;;  %v1481_v26 = vrot.slane %v1454_v9, %v1331_v27 }
  0xa9   :  { %v1471_v8 = vrot.slane %v1458_v60, %v1318_v23  ;;  %v362_v18 = vmul.f32 %v352_v11, %v338_v12  ;;  %1150 = vtanh.f32 %v295_v13  ;;  %v1485_v29 = vrot.slane %v1456_v57, %v1331_v27  ;;  %v1556_v13 = vpop.permute.xlu0 %382 }
  0xaa   :  { %v363_v15 = vmul.f32 %v1467_v7, %v338_v12  ;;  %v1489_v51 = vrot.slane %v1452_v55, %v1334_v28  ;;  %v1493_v30 = vrot.slane %v1452_v55, %v1355_v40  ;;  %v1497_v52 = vrot.slane %v1458_v60, %v1331_v27 }
  0xab   :  { %v364_v20 = vmul.f32 %v1471_v8, %v338_v12  ;;  %1152 = vtanh.f32 %v296_v16  ;;  %v369_v53 = vadd.f32 %v361_v17, %v328_v0  ;;  %v370_v42 = vadd.f32 %v362_v18, %v328_v0 }
  0xac   :  { %v1473_v14 = vpop.permute.xlu1 %458  ;;  %1849 = vst [vmem:[#allocation8_spill] sm:$0xff] %v1493_v30  ;;  %v371_v43 = vadd.f32 %v363_v15, %v328_v0  ;;  %v1503_v45 = vrot.slane %v1454_v9, %v1334_v28  ;;  %v401_v35 = vmul.f32 %v388_v25, %v379_v59  ;;  %v402_v54 = vmul.f32 %v1481_v26, %v379_v59 }
  0xad   :  { %v372_v46 = vadd.f32 %v364_v20, %v328_v0  ;;  %v403_v36 = vmul.f32 %v1485_v29, %v379_v59  ;;  %v1509_v19 = vrot.slane %v1452_v55, %v1341_v33  ;;  %v1513_v37 = vrot.slane %v1454_v9, %v1341_v33 }
  0xae   :  { %v1517_v38 = vrot.slane %v1456_v57, %v1341_v33  ;;  %v1521_v0 = vrot.slane %v1456_v57, %v1334_v28  ;;  %v1525_v41 = vrot.slane %v1454_v9, %v1355_v40  ;;  %v1529_v44 = vrot.slane %v1456_v57, %v1355_v40 }
  0xaf   :  { %v404_v47 = vmul.f32 %v1497_v52, %v379_v59  ;;  %v409_v48 = vadd.f32 %v401_v35, %v369_v53  ;;  %v410_v2 = vadd.f32 %v402_v54, %v370_v42  ;;  %v411_v50 = vadd.f32 %v403_v36, %v371_v43 }
  0xb0   :  { %1850 = vst [vmem:[#allocation9_spill] sm:$0xff] %v1525_v41  ;;  %v1534_v3 = vrot.slane %v1458_v60, %v1341_v33  ;;  %v1540_v58 = vrot.slane %v1458_v60, %v1334_v28  ;;  %v1544_v4 = vrot.slane %v1458_v60, %v1355_v40  ;;  %v1546_v61 = vmul.f32 %v348_v10, %v343_v32 }
  0xb1   :  { %v1499_v31 = vpop.permute.xlu1 %498  ;;  %v1147_v1 = vpop.eup %1146  ;;  %v1548_v59 = vmul.f32 %v352_v11, %v343_v32  ;;  %v412_v62 = vadd.f32 %v404_v47, %v372_v46  ;;  %v441_v5 = vmul.f32 %v1509_v19, %v1433_v49  ;;  %v442_v33 = vmul.f32 %v1513_v37, %v1433_v49 }
  0xb2   :  { %v443_v6 = vmul.f32 %v1517_v38, %v1433_v49  ;;  %v1149_v28 = vpop.eup %1148  ;;  %v309_v12 = vmul.f32 0.5, %v1147_v1  ;;  %v1560_v40 = vrot.slane %v1452_v55, %v1352_v39  ;;  %v1564_v10 = vrot.slane %v1454_v9, %v1352_v39 }
  0xb3   :  { %v1568_v11 = vrot.slane %v1456_v57, %v1352_v39  ;;  %v1151_v16 = vpop.eup %1150  ;;  %v444_v17 = vmul.f32 %v1534_v3, %v1433_v49  ;;  %v449_v18 = vadd.f32 %v441_v5, %v409_v48  ;;  %v450_v15 = vadd.f32 %v442_v33, %v410_v2 }
  0xb4   :  { %v451_v20 = vadd.f32 %v443_v6, %v411_v50  ;;  %v1574_v53 = vrot.slane %v1458_v60, %v1352_v39  ;;  %v481_v42 = vmul.f32 %v1560_v40, %v1473_v14  ;;  %v482_v43 = vmul.f32 %v1564_v10, %v1473_v14 }
  0xb5   :  { %v483_v46 = vmul.f32 %v1568_v11, %v1473_v14  ;;  %v1153_v35 = vpop.eup %1152  ;;  %v310_v36 = vmul.f32 0.5, %v1149_v28  ;;  %v1583_v49 = vmul.f32 %v1467_v7, %v343_v32  ;;  %v1586_v47 = vmul.f32 %v1471_v8, %v343_v32 }
  0xb6   :  { %v1536_v56 = vpop.permute.xlu1 %578  ;;  %v1589_v39 = vmul.f32 %v388_v25, %v1556_v13  ;;  %v311_v1 = vmul.f32 0.5, %v1151_v16  ;;  %v317_v48 = vadd.f32 0.5, %v309_v12  ;;  %v452_v2 = vadd.f32 %v444_v17, %v412_v62 }
  0xb7   :  { %v484_v50 = vmul.f32 %v1574_v53, %v1473_v14  ;;  %v1595_v5 = vrot.slane %v1452_v55, %v1321_v24  ;;  %v1599_v7 = vrot.slane %v1454_v9, %v1321_v24  ;;  %v1603_v8 = vrot.slane %v1456_v57, %v1321_v24 }
  0xb8   :  { %v1607_v25 = vrot.slane %v1458_v60, %v1321_v24  ;;  %v312_v32 = vmul.f32 0.5, %v1153_v35  ;;  %v489_v62 = vadd.f32 %v481_v42, %v449_v18  ;;  %v490_v33 = vadd.f32 %v482_v43, %v450_v15 }
  0xb9   :  { %v491_v14 = vadd.f32 %v483_v46, %v451_v20  ;;  %v521_v6 = vmul.f32 %v1595_v5, %v1499_v31  ;;  %v522_v28 = vmul.f32 %v1599_v7, %v1499_v31  ;;  %v523_v12 = vmul.f32 %v1603_v8, %v1499_v31 }
  0xba   :  { %v524_v16 = vmul.f32 %v1607_v25, %v1499_v31  ;;  %v318_v21 = vadd.f32 0.5, %v310_v36  ;;  %v319_v24 = vadd.f32 0.5, %v311_v1  ;;  %v1618_v35 = vrot.slane %v317_v48, %v1318_v23 }
  0xbb   :  { %v619_v54 = vpop.permute.xlu1 %618  ;;  %v1622_v18 = vmul.f32 %v1481_v26, %v1556_v13  ;;  %v492_v15 = vadd.f32 %v484_v50, %v452_v2  ;;  %v529_v20 = vadd.f32 %v521_v6, %v489_v62  ;;  %v530_v42 = vadd.f32 %v522_v28, %v490_v33 }
  0xbc   :  { %v531_v43 = vadd.f32 %v523_v12, %v491_v14  ;;  %v320_v46 = vadd.f32 0.5, %v312_v32  ;;  %v561_v22 = vmul.f32 %v1489_v51, %v1435_v63  ;;  %v562_v31 = vmul.f32 %v1503_v45, %v1435_v63 }
  0xbd   :  { %v1630_v36 = vrot.slane %v1452_v55, %v1344_v34  ;;  %v532_v1 = vadd.f32 %v524_v16, %v492_v15  ;;  %v563_v26 = vmul.f32 %v1521_v0, %v1435_v63  ;;  %v1636_v2 = vrot.slane %v1454_v9, %v1344_v34 }
  0xbe   :  { %v1640_v50 = vrot.slane %v1456_v57, %v1344_v34  ;;  %v564_v32 = vmul.f32 %v1540_v58, %v1435_v63  ;;  %v569_v62 = vadd.f32 %v561_v22, %v529_v20  ;;  %v1646_v55 = vrot.slane %v1458_v60, %v1344_v34 }
  0xbf   :  { %v601_v33 = vmul.f32 %v1630_v36, %v1536_v56  ;;  %v570_v6 = vadd.f32 %v562_v31, %v530_v42  ;;  %v571_v28 = vadd.f32 %v563_v26, %v531_v43  ;;  %v602_v9 = vmul.f32 %v1636_v2, %v1536_v56 }
  0xc0   :  { %v659_v17 = vpop.permute.xlu1 %658  ;;  %1851 = vst [vmem:[#allocation10_spill] sm:$0xff] %v1640_v50  ;;  %1852 = vst [vmem:[#allocation11_spill] sm:$0xff] %v1646_v55  ;;  %v603_v57 = vmul.f32 %v1640_v50, %v1536_v56  ;;  %v1655_v12 = vrot.slane %v318_v21, %v1318_v23  ;;  %v1658_v22 = vrot.slane %v319_v24, %v1318_v23 }
  0xc1   :  { %v1661_v34 = vrot.slane %v317_v48, %v1331_v27  ;;  %v1664_v63 = vrot.slane %v318_v21, %v1331_v27  ;;  %v572_v60 = vadd.f32 %v564_v32, %v532_v1  ;;  %v604_v16 = vmul.f32 %v1646_v55, %v1536_v56 }
  0xc2   :  { %v641_v15 = vmul.f32 %v1493_v30, %v619_v54  ;;  %v642_v20 = vmul.f32 %v1525_v41, %v619_v54  ;;  %v1671_v42 = vrot.slane %v320_v46, %v1318_v23  ;;  %v1674_v43 = vrot.slane %v319_v24, %v1331_v27 }
  0xc3   :  { %v1677_v48 = vrot.slane %v320_v46, %v1331_v27  ;;  %v609_v31 = vadd.f32 %v601_v33, %v569_v62  ;;  %v610_v21 = vadd.f32 %v602_v9, %v570_v6  ;;  %v611_v26 = vadd.f32 %v603_v57, %v571_v28 }
  0xc4   :  { %v643_v1 = vmul.f32 %v1529_v44, %v619_v54  ;;  %v644_v56 = vmul.f32 %v1544_v4, %v619_v54  ;;  %v681_v41 = vmul.f32 %v1618_v35, %v659_v17  ;;  %v682_v23 = vmul.f32 %v1655_v12, %v659_v17 }
  0xc5   :  { %v333_v14 = vpop.permute.xlu1 %332  ;;  %v649_v55 = vadd.f32 %v641_v15, %v609_v31  ;;  %v683_v30 = vmul.f32 %v1658_v22, %v659_v17  ;;  %v612_v24 = vadd.f32 %v604_v16, %v572_v60  ;;  %v650_v50 = vadd.f32 %v642_v20, %v610_v21  ;;  %v463_v20 = vpop.permute.xlu0 %462 }
  0xc6   :  { %v684_v27 = vmul.f32 %v1671_v42, %v659_v17  ;;  %v651_v62 = vadd.f32 %v643_v1, %v611_v26  ;;  %v373_v28 = vadd.f32 %v1546_v61, %v333_v14  ;;  %v374_v9 = vadd.f32 %v1548_v59, %v333_v14 }
  0xc7   :  { %v689_v33 = vadd.f32 %v681_v41, %v649_v55  ;;  %v652_v57 = vadd.f32 %v644_v56, %v612_v24  ;;  %v690_v15 = vadd.f32 %v682_v23, %v650_v50  ;;  %v375_v31 = vadd.f32 %v1583_v49, %v333_v14 }
  0xc8   :  { %v691_v60 = vadd.f32 %v683_v30, %v651_v62  ;;  %v376_v41 = vadd.f32 %v1586_v47, %v333_v14  ;;  %v407_v55 = vmul.f32 %v1485_v29, %v1556_v13  ;;  %v408_v30 = vmul.f32 %v1497_v52, %v1556_v13 }
  0xc9   :  { %v692_v26 = vadd.f32 %v684_v27, %v652_v57  ;;  %v413_v50 = vadd.f32 %v1589_v39, %v373_v28  ;;  %v414_v56 = vadd.f32 %v1622_v18, %v374_v9  ;;  %v485_v52 = vmul.f32 %v1560_v40, %v463_v20 }
  0xca   :  { %v699_v32 = vpop.permute.xlu1 %698  ;;  %v415_v14 = vadd.f32 %v407_v55, %v375_v31  ;;  %v416_v24 = vadd.f32 %v408_v30, %v376_v41  ;;  %v486_v13 = vmul.f32 %v1564_v10, %v463_v20  ;;  %v487_v39 = vmul.f32 %v1568_v11, %v463_v20 }
  0xcb   :  { %v721_v46 = vmul.f32 %v1661_v34, %v699_v32  ;;  %v722_v6 = vmul.f32 %v1664_v63, %v699_v32  ;;  %v723_v54 = vmul.f32 %v1674_v43, %v699_v32  ;;  %v724_v16 = vmul.f32 %v1677_v48, %v699_v32 }
  0xcd   :  { %v729_v17 = vadd.f32 %v721_v46, %v689_v33  ;;  %v730_v1 = vadd.f32 %v722_v6, %v690_v15  ;;  %v731_v49 = vadd.f32 %v723_v54, %v691_v60  ;;  %v732_v29 = vadd.f32 %v724_v16, %v692_v26  ;;  %v583_v33 = vpop.permute.xlu0 %582 }
  0xcf   :  { %v423_v21 = vpop.permute.xlu1 %422  ;;  %v737_v32 = vmul.f32 0.5, %v729_v17  ;;  %v738_v46 = vmul.f32 0.5, %v730_v1  ;;  %v740_v18 = vmul.f32 0.5, %v732_v29  ;;  %v1856_v29 = vld [vmem:[#allocation9_spill] sm:$0xff] }
  0xd0   :  { %v445_v61 = vmul.f32 %v1509_v19, %v423_v21  ;;  %v446_v59 = vmul.f32 %v1513_v37, %v423_v21  ;;  %v447_v23 = vmul.f32 %v1517_v38, %v423_v21  ;;  %v448_v47 = vmul.f32 %v1534_v3, %v423_v21 }
  0xd1   :  { %v739_v38 = vmul.f32 0.5, %v731_v49  ;;  %v488_v3 = vmul.f32 %v1574_v53, %v463_v20  ;;  %1154 = vtanh.f32 %v737_v32  ;;  %v703_v17 = vpop.permute.xlu0 %702 }
  0xd2   :  { %v453_v27 = vadd.f32 %v445_v61, %v413_v50  ;;  %v454_v19 = vadd.f32 %v446_v59, %v414_v56  ;;  %v455_v62 = vadd.f32 %v447_v23, %v415_v14  ;;  %v456_v6 = vadd.f32 %v448_v47, %v416_v24  ;;  %v1855_v50 = vld [vmem:[#allocation11_spill] sm:$0xff] }
  0xd3   :  { %1156 = vtanh.f32 %v738_v46  ;;  %v608_v56 = vmul.f32 %v1855_v50, %v583_v33 }
  0xd4   :  { %v503_v37 = vpop.permute.xlu1 %502  ;;  %v493_v54 = vadd.f32 %v485_v52, %v453_v27  ;;  %v494_v28 = vadd.f32 %v486_v13, %v454_v19  ;;  %v495_v57 = vadd.f32 %v487_v39, %v455_v62  ;;  %1158 = vtanh.f32 %v739_v38 }
  0xd5   :  { %v525_v9 = vmul.f32 %v1595_v5, %v503_v37  ;;  %v526_v15 = vmul.f32 %v1599_v7, %v503_v37  ;;  %v527_v31 = vmul.f32 %v1603_v8, %v503_v37  ;;  %v496_v60 = vadd.f32 %v488_v3, %v456_v6  ;;  %v774_v61 = vpop.permute.xlu0 %773 }
  0xd6   :  { %v528_v10 = vmul.f32 %v1607_v25, %v503_v37  ;;  %1160 = vtanh.f32 %v740_v18 }
  0xd7   :  { %v533_v20 = vadd.f32 %v525_v9, %v493_v54  ;;  %v534_v21 = vadd.f32 %v526_v15, %v494_v28  ;;  %v535_v7 = vadd.f32 %v527_v31, %v495_v57  ;;  %v1857_v54 = vld [vmem:[#allocation7_spill] sm:$0xff] }
  0xd8   :  { %v536_v41 = vadd.f32 %v528_v10, %v496_v60 }
  0xd9   :  { %v543_v40 = vpop.permute.xlu1 %542 }
  0xda   :  { %v565_v11 = vmul.f32 %v1489_v51, %v543_v40  ;;  %v566_v53 = vmul.f32 %v1503_v45, %v543_v40  ;;  %v567_v16 = vmul.f32 %v1521_v0, %v543_v40  ;;  %v568_v5 = vmul.f32 %v1540_v58, %v543_v40  ;;  %v1853_v0 = vld [vmem:[#allocation10_spill] sm:$0xff]  ;;  %v1854_v58 = vld [vmem:[#allocation8_spill] sm:$0xff] }
  0xdb   :  { %v605_v51 = vmul.f32 %v1630_v36, %v583_v33  ;;  %v1155_v59 = vpop.eup %1154  ;;  %v606_v45 = vmul.f32 %v1636_v2, %v583_v33  ;;  %v607_v23 = vmul.f32 %v1853_v0, %v583_v33  ;;  %v883_v33 = vpop.permute.xlu0 %882 }
  0xdc   :  { %v573_v8 = vadd.f32 %v565_v11, %v533_v20  ;;  %v574_v26 = vadd.f32 %v566_v53, %v534_v21  ;;  %v575_v1 = vadd.f32 %v567_v16, %v535_v7  ;;  %v576_v25 = vadd.f32 %v568_v5, %v536_v41 }
  0xdd   :  { %v1157_v49 = vpop.eup %1156  ;;  %v753_v2 = vmul.f32 0.5, %v1155_v59  ;;  %v726_v11 = vmul.f32 %v1664_v63, %v703_v17  ;;  %v727_v53 = vmul.f32 %v1674_v43, %v703_v17  ;;  %v728_v16 = vmul.f32 %v1677_v48, %v703_v17 }
  0xde   :  { %v623_v55 = vpop.permute.xlu1 %622  ;;  %v613_v47 = vadd.f32 %v605_v51, %v573_v8  ;;  %v1159_v14 = vpop.eup %1158  ;;  %v614_v24 = vadd.f32 %v606_v45, %v574_v26  ;;  %v615_v27 = vadd.f32 %v607_v23, %v575_v1  ;;  %v616_v37 = vadd.f32 %v608_v56, %v576_v25 }
  0xdf   :  { %v645_v30 = vmul.f32 %v1854_v58, %v623_v55  ;;  %v646_v32 = vmul.f32 %v1856_v29, %v623_v55  ;;  %v647_v19 = vmul.f32 %v1529_v44, %v623_v55  ;;  %v648_v36 = vmul.f32 %v1544_v4, %v623_v55  ;;  %v967_v21 = vpop.permute.xlu0 %966 }
  0xe0   :  { %v754_v6 = vmul.f32 0.5, %v1157_v49  ;;  %v1161_v52 = vpop.eup %1160  ;;  %v755_v18 = vmul.f32 0.5, %v1159_v14  ;;  %v888_v44 = vrot.slane %v883_v33, %v1857_v54  ;;  %v1728_v15 = vadd.f32 0.5, %v753_v2 }
  0xe1   :  { %v653_v3 = vadd.f32 %v645_v30, %v613_v47  ;;  %v654_v28 = vadd.f32 %v646_v32, %v614_v24  ;;  %v655_v4 = vadd.f32 %v647_v19, %v615_v27  ;;  %v656_v9 = vadd.f32 %v648_v36, %v616_v37 }
  0xe2   :  { %v1730_v40 = vadd.f32 0.5, %v754_v6  ;;  %v1739_v20 = vmul.f32 %v888_v44, %v1728_v15  ;;  %v779_v25 = vrot.slane %v774_v61, %v1857_v54  ;;  %v972_v51 = vrot.slane %v967_v21, %v1857_v54 }
  0xe3   :  { %v663_v46 = vpop.permute.xlu1 %662 }
  0xe4   :  { %v685_v62 = vmul.f32 %v1618_v35, %v663_v46  ;;  %v686_v38 = vmul.f32 %v1655_v12, %v663_v46  ;;  %v687_v13 = vmul.f32 %v1658_v22, %v663_v46  ;;  %v688_v39 = vmul.f32 %v1671_v42, %v663_v46 }
  0xe5   :  { %v756_v12 = vmul.f32 0.5, %v1161_v52  ;;  %v725_v22 = vmul.f32 %v1661_v34, %v703_v17  ;;  %v1733_v42 = vadd.f32 0.5, %v755_v18  ;;  %v1745_v34 = vmul.f32 %v888_v44, %v1730_v40 }
  0xe6   :  { %v693_v57 = vadd.f32 %v685_v62, %v653_v3  ;;  %v694_v31 = vadd.f32 %v686_v38, %v654_v28  ;;  %v695_v60 = vadd.f32 %v687_v13, %v655_v4  ;;  %v696_v10 = vadd.f32 %v688_v39, %v656_v9 }
  0xe7   :  { %v1742_v8 = vadd.f32 0.5, %v756_v12  ;;  %v1748_v43 = vmul.f32 %v888_v44, %v1733_v42  ;;  %v1204_v17 = vmov 1966171168   ;;  %v897_v45 = vrot.slane %v1739_v20, 4 }
  0xe8   :  { %v783_v35 = vpop.permute.xlu1 %782  ;;  %v733_v5 = vadd.f32 %v725_v22, %v693_v57  ;;  %v734_v41 = vadd.f32 %v726_v11, %v694_v31  ;;  %v735_v26 = vadd.f32 %v727_v53, %v695_v60  ;;  %v736_v63 = vadd.f32 %v728_v16, %v696_v10 }
  0xe9   :  { %v788_v7 = vrot.slane %v783_v35, %v1857_v54  ;;  %v1751_v1 = vunpack.c.l.s4 %v1204_v17  ;;  %v1758_v49 = vmul.f32 %v888_v44, %v1742_v8  ;;  %v898_v58 = vrot.slane %v1745_v34, 4 }
  0xea   :  { %v741_v59 = vmul.f32 0.5, %v733_v5  ;;  %v742_v0 = vmul.f32 0.5, %v734_v41  ;;  %v743_v30 = vmul.f32 0.5, %v735_v26  ;;  %v744_v50 = vmul.f32 0.5, %v736_v63 }
  0xeb   :  { %v789_v23 = vmul.f32 %v788_v7, %v1728_v15  ;;  %v790_v56 = vmul.f32 %v788_v7, %v1730_v40  ;;  %v899_v47 = vrot.slane %v1748_v43, 4  ;;  %v791_v14 = vmul.f32 %v788_v7, %v1733_v42 }
  0xec   :  { %1162 = vtanh.f32 %v741_v59  ;;  %v792_v19 = vmul.f32 %v788_v7, %v1742_v8  ;;  %v900_v37 = vrot.slane %v1758_v49, 4  ;;  %v1772_v2 = vmul.f32 %v972_v51, %v1728_v15 }
  0xed   :  { %v799_v55 = vpop.permute.xlu1 %798  ;;  %1164 = vtanh.f32 %v742_v0  ;;  %v793_v46 = vadd.f32 %v789_v23, %v779_v25  ;;  %v794_v18 = vadd.f32 %v790_v56, %v779_v25  ;;  %v795_v44 = vadd.f32 %v791_v14, %v779_v25 }
  0xee   :  { %v804_v48 = vrot.slane %v799_v55, %v1857_v54  ;;  %1166 = vtanh.f32 %v743_v30  ;;  %v796_v31 = vadd.f32 %v792_v19, %v779_v25  ;;  %v1780_v12 = vmul.f32 %v972_v51, %v1730_v40 }
  0xef   :  { %1168 = vtanh.f32 %v744_v50  ;;  %v1783_v60 = vmul.f32 %v972_v51, %v1733_v42  ;;  %v1786_v10 = vmul.f32 %v972_v51, %v1742_v8 }
  0xf0   :  { %v805_v29 = vmul.f32 %v804_v48, %v1728_v15  ;;  %v806_v32 = vmul.f32 %v804_v48, %v1730_v40  ;;  %v807_v24 = vmul.f32 %v804_v48, %v1733_v42  ;;  %v808_v36 = vmul.f32 %v804_v48, %v1742_v8 }
  0xf1   :  { %v982_v14 = vrot.slane %v1780_v12, 7  ;;  %v984_v20 = vrot.slane %v1786_v10, 7 }
  0xf2   :  { %v827_v61 = vpop.permute.xlu1 %826  ;;  %v813_v52 = vrot.slane %v805_v29, 1  ;;  %v814_v33 = vrot.slane %v806_v32, 1  ;;  %v815_v13 = vrot.slane %v807_v24, 1  ;;  %v816_v28 = vrot.slane %v808_v36, 1 }
  0xf3   :  { %v832_v27 = vrot.slane %v827_v61, %v1857_v54  ;;  %v981_v61 = vrot.slane %v1772_v2, 7 }
  0xf4   :  { %v821_v22 = vadd.f32 %v813_v52, %v793_v46  ;;  %v822_v11 = vadd.f32 %v814_v33, %v794_v18  ;;  %v823_v53 = vadd.f32 %v815_v13, %v795_v44  ;;  %v824_v5 = vadd.f32 %v816_v28, %v796_v31 }
  0xf5   :  { %v833_v62 = vmul.f32 %v832_v27, %v1728_v15  ;;  %v834_v38 = vmul.f32 %v832_v27, %v1730_v40  ;;  %v835_v6 = vmul.f32 %v832_v27, %v1733_v42  ;;  %v836_v39 = vmul.f32 %v832_v27, %v1742_v8 }
  0xf6   :  { %v1163_v25 = vpop.eup %1162 }
  0xf7   :  { %v855_v3 = vpop.permute.xlu1 %854  ;;  %v841_v9 = vrot.slane %v833_v62, 2  ;;  %v842_v57 = vrot.slane %v834_v38, 2  ;;  %v843_v35 = vrot.slane %v835_v6, 2  ;;  %v844_v16 = vrot.slane %v836_v39, 2  ;;  %v1165_v30 = vpop.eup %1164 }
  0xf8   :  { %v860_v4 = vrot.slane %v855_v3, %v1857_v54  ;;  %v1167_v29 = vpop.eup %1166  ;;  %v983_v39 = vrot.slane %v1783_v60, 7 }
  0xf9   :  { %v849_v26 = vadd.f32 %v841_v9, %v821_v22  ;;  %v850_v63 = vadd.f32 %v842_v57, %v822_v11  ;;  %v851_v48 = vadd.f32 %v843_v35, %v823_v53  ;;  %v852_v50 = vadd.f32 %v844_v16, %v824_v5  ;;  %v1169_v6 = vpop.eup %1168 }
  0xfa   :  { %v861_v21 = vmul.f32 %v860_v4, %v1728_v15  ;;  %v862_v7 = vmul.f32 %v860_v4, %v1730_v40  ;;  %v863_v41 = vmul.f32 %v860_v4, %v1733_v42  ;;  %v864_v17 = vmul.f32 %v860_v4, %v1742_v8 }
  0xfb   :  { %v757_v4 = vmul.f32 0.5, %v1163_v25  ;;  %v759_v34 = vmul.f32 0.5, %v1167_v29  ;;  %v760_v31 = vmul.f32 0.5, %v1169_v6  ;;  %v1858_v6 = vld [vmem:[#allocation6_spill] sm:$0xff] }
  0xfc   :  { %v911_v55 = vpop.permute.xlu1 %910  ;;  %v869_v59 = vrot.slane %v861_v21, 3  ;;  %v870_v0 = vrot.slane %v862_v7, 3  ;;  %v871_v23 = vrot.slane %v863_v41, 3  ;;  %v872_v56 = vrot.slane %v864_v17, 3 }
  0xfd   :  { %v916_v51 = vrot.slane %v911_v55, %v1857_v54  ;;  %v765_v21 = vadd.f32 0.5, %v757_v4  ;;  %v767_v41 = vadd.f32 0.5, %v759_v34  ;;  %v768_v55 = vadd.f32 0.5, %v760_v31 }
  0xfe   :  { %v877_v32 = vadd.f32 %v869_v59, %v849_v26  ;;  %v878_v24 = vadd.f32 %v870_v0, %v850_v63  ;;  %v879_v27 = vadd.f32 %v871_v23, %v851_v48  ;;  %v880_v36 = vadd.f32 %v872_v56, %v852_v50 }
  0xff   :  { %v917_v19 = vmul.f32 %v916_v51, %v1728_v15  ;;  %v918_v46 = vmul.f32 %v916_v51, %v1730_v40  ;;  %v919_v62 = vmul.f32 %v916_v51, %v1733_v42  ;;  %v920_v38 = vmul.f32 %v916_v51, %v1742_v8 }
 0x100   :  { %v905_v2 = vadd.f32 %v897_v45, %v877_v32  ;;  %v906_v33 = vadd.f32 %v898_v58, %v878_v24  ;;  %v907_v18 = vadd.f32 %v899_v47, %v879_v27  ;;  %v908_v9 = vadd.f32 %v900_v37, %v880_v36 }
 0x101   :  { %v939_v52 = vpop.permute.xlu1 %938  ;;  %v925_v13 = vrot.slane %v917_v19, 5  ;;  %v926_v44 = vrot.slane %v918_v46, 5  ;;  %v927_v28 = vrot.slane %v919_v62, 5  ;;  %v928_v57 = vrot.slane %v920_v38, 5 }
 0x102   :  { %v944_v3 = vrot.slane %v939_v52, %v1857_v54  ;;  %v758_v45 = vmul.f32 0.5, %v1165_v30  ;;  %v1045_v50 = vunpack.c.0.s8 %v1751_v1 }
 0x103   :  { %v933_v12 = vadd.f32 %v925_v13, %v905_v2  ;;  %v934_v22 = vadd.f32 %v926_v44, %v906_v33  ;;  %v935_v11 = vadd.f32 %v927_v28, %v907_v18  ;;  %v936_v10 = vadd.f32 %v928_v57, %v908_v9 }
 0x104   :  { %v945_v58 = vmul.f32 %v944_v3, %v1728_v15  ;;  %v946_v35 = vmul.f32 %v944_v3, %v1730_v40  ;;  %v947_v43 = vmul.f32 %v944_v3, %v1733_v42  ;;  %v948_v47 = vmul.f32 %v944_v3, %v1742_v8 }
 0x105   :  { %v766_v15 = vadd.f32 0.5, %v758_v45  ;;  %v1048_v52 = vsub.s32 %v1045_v50, %v1858_v6  ;;  %v1859_v28 = vlaneseq }
 0x106   :  { %v995_v60 = vpop.permute.xlu1 %994  ;;  %v953_v49 = vrot.slane %v945_v58, 6  ;;  %v954_v37 = vrot.slane %v946_v35, 6  ;;  %v955_v16 = vrot.slane %v947_v43, 6  ;;  %v956_v5 = vrot.slane %v948_v47, 6 }
 0x107   :  { %v1000_v53 = vrot.slane %v995_v60, %v1857_v54  ;;  %vm1068_vm0 = vcmp.lt.s32.totalorder %v1859_v28, 512 }
 0x108   :  { %v961_v7 = vadd.f32 %v953_v49, %v933_v12  ;;  %v962_v40 = vadd.f32 %v954_v37, %v934_v22  ;;  %v963_v26 = vadd.f32 %v955_v16, %v935_v11  ;;  %v964_v42 = vadd.f32 %v956_v5, %v936_v10 }
 0x109   :  { %v1001_v48 = vmul.f32 %v1000_v53, %v765_v21  ;;  %v1002_v17 = vmul.f32 %v1000_v53, %v766_v15  ;;  %v1003_v0 = vmul.f32 %v1000_v53, %v767_v41  ;;  %v1004_v23 = vmul.f32 %v1000_v53, %v768_v55 }
 0x10a   :  { %v989_v63 = vadd.f32 %v981_v61, %v961_v7  ;;  %v990_v8 = vadd.f32 %v982_v14, %v962_v40  ;;  %v991_v51 = vadd.f32 %v983_v39, %v963_v26  ;;  %v992_v59 = vadd.f32 %v984_v20, %v964_v42 }
 0x10b   :  { %v1011_v25 = vpop.permute.xlu1 %1010 }
 0x10c   :  { %v1016_v30 = vrot.slane %v1011_v25, %v1857_v54  ;;  %v1005_v27 = vadd.f32 %v1001_v48, %v989_v63  ;;  %v1006_v19 = vadd.f32 %v1002_v17, %v990_v8  ;;  %v1007_v36 = vadd.f32 %v1003_v0, %v991_v51 }
 0x10d   :  { %v1008_v61 = vadd.f32 %v1004_v23, %v992_v59 }
 0x10e   :  { %v1017_v56 = vmul.f32 %v1016_v30, %v765_v21  ;;  %v1018_v29 = vmul.f32 %v1016_v30, %v766_v15  ;;  %v1019_v32 = vmul.f32 %v1016_v30, %v767_v41  ;;  %v1020_v24 = vmul.f32 %v1016_v30, %v768_v55 }
 0x110   :  { %v1025_v14 = vrot.slane %v1017_v56, 1  ;;  %v1026_v46 = vrot.slane %v1018_v29, 1  ;;  %v1027_v62 = vrot.slane %v1019_v32, 1  ;;  %v1028_v38 = vrot.slane %v1020_v24, 1 }
 0x112   :  { %v1033_v2 = vadd.f32 %v1025_v14, %v1005_v27  ;;  %v1034_v33 = vadd.f32 %v1026_v46, %v1006_v19  ;;  %v1035_v13 = vadd.f32 %v1027_v62, %v1007_v36  ;;  %v1036_v54 = vadd.f32 %v1028_v38, %v1008_v61 }
 0x114   :  { %v1041_v39 = vcombine.low %v1033_v2, %v1034_v33  ;;  %v1042_v1 = vcombine.low %v1035_v13, %v1036_v54 }
 0x116   :  { %v1049_v3 = vrot.slane %v1041_v39, %v1048_v52  ;;  %v1056_v18 = vrot.slane %v1042_v1, %v1048_v52 }
 0x118   :  { %v1057_v44 = vcombine.low %v1049_v3, %v1056_v18 }
 0x11a   :  { %v1064_v4 = vrot.slane %v1057_v44, %v1048_v52 }
 0x11c   :  { %1070 = vst.msk [vmem:[#allocation3] sm:$0xf] %vm1068_vm0, %v1064_v4 }
 0x11d   :  { %1181 = shalt.err (!%p1178_p4)
}
 0x11e   :  { %s1182_s23 = scalar_lea.hbm %s1838_s7, 64 }
 0x11f   :  { %p1183_p5 = scmp.ne.s32.totalorder %s1838_s7, %s1182_s23  ;;  %p1186_p6 = scmp.lt.u32.totalorder %s1182_s23, %s1838_s7 }
 0x121   :  { %p1188_p7 = pnand %p1186_p6, %p1183_p5 }
 0x123   :  { %1191 = shalt.err (!%p1188_p7)
}
 0x124   :  { %1080 = dma.vmem_to_hbm [thread:$0]  %s1078_s19, 64, %s1838_s7, [#allocation4]  }
 0x125   :  { %1192 = dma.done.wait [#allocation4], 64  }
 0x126   :  { %1193 = vsyncadd [#allocation4], 4294967232 }
 0x127   :  { %1084 = vsyncpa [#allocation4], 1 }

</bundles_post_ra>
